<compile_context>
chip_gen: v7x
topology: tpu7x:2x2x1
jax: 0.10.0
libtpu: 0.0.40
codegen_flags: <defaults>
</compile_context>

<pallas_src>
import functools

import numpy as np
import jax
import jax.numpy as jnp
from jax.experimental import pallas as pl
from jax.experimental.pallas import tpu as pltpu


def _hyper_embed_kernel(hi_ref, wcatT_ref, bw0_ref, weT_ref, bwe_ref,
                        bcatT_ref, bb0_ref, w_out_ref, b_out_ref, xs_ref,
                        *, in_channels, mid_channels, out_channels, kk):
    # hi_ref: (1, 1, P+L) — [h_row | index] for the current batch element.
    hi = hi_ref[0]                                                  # (1, P+L)

    # fc_w_param(h) + fc_w_index(index): one fused matmul (weights pre-stacked).
    wf = (jnp.dot(hi, wcatT_ref[...], preferred_element_type=jnp.float32)
          + bw0_ref[...])                                           # (1, in*mid)

    # (1, in*mid) -> (in, mid) without a vector relayout: static lane slices
    # written row-by-row into a small VMEM scratch.
    for c in range(in_channels):
        xs_ref[c:c + 1, :] = wf[:, c * mid_channels:(c + 1) * mid_channels]
    x = xs_ref[...]                                                 # (in, mid)

    # fc_w_embed: single lane-dense MXU matmul.
    e = (jnp.dot(x, weT_ref[...], preferred_element_type=jnp.float32)
         + bwe_ref[...])                                            # (in, out*kk)

    # Fused swapaxes(-4, -3): store per-out-channel slabs so the HBM layout is
    # already (out, in, kh*kw); no wrapper-side transpose over the big tensor.
    for o in range(out_channels):
        w_out_ref[0, o] = e[:, o * kk:(o + 1) * kk]                 # (in, kk)

    # Bias head: fc_b_param(h) + fc_b_index(index), also fused into one dot.
    b_out_ref[0] = (jnp.dot(hi, bcatT_ref[...], preferred_element_type=jnp.float32)
                    + bb0_ref[...])                                 # (1, out)


def hyper_conv2d_embedder(h, index, params, dim_w):
    """Forward pass of HyperConv2dEmbedder.

    h: (*, n_params); index: (n_layers,) one-hot.
    params: dict of (weight, bias) tuples for fc_w_param / fc_w_index /
            fc_w_embed / fc_b_param / fc_b_index (PyTorch Linear layout:
            weight (out_features, in_features)).
    Returns (w, b) with w: (*, out, in, kh, kw), b: (*, out).
    """
    # TODO(synk): dim_b=None variant (module without the bias head) is not implemented.
    out_ch, in_ch, kh, kw = dim_w
    kk = kh * kw
    f32 = jnp.float32

    W_wp, b_wp = params["fc_w_param"]     # (mid*in, P), (mid*in,)
    W_wi, b_wi = params["fc_w_index"]     # (mid*in, L), (mid*in,)
    W_we, b_we = params["fc_w_embed"]     # (out*kk, mid), (out*kk,)
    W_bp, b_bp = params["fc_b_param"]     # (out, P), (out,)
    W_bi, b_bi = params["fc_b_index"]     # (out, L), (out,)

    P = W_wp.shape[1]
    L = W_wi.shape[1]
    mid = W_we.shape[1]
    assert W_wp.shape[0] == mid * in_ch and W_we.shape[0] == out_ch * kk

    batch_shape = h.shape[:-1]
    B = int(np.prod(batch_shape)) if len(batch_shape) else 1

    # Inputs: concatenate [h | index] (index broadcast over batch) so both the
    # "param" and "index" linears become a single matmul in the kernel.
    hf = jnp.asarray(h, f32).reshape(B, P)
    ix = jnp.asarray(index, f32)
    hi = jnp.concatenate([hf, jnp.broadcast_to(ix[None, :], (B, L))], axis=-1)
    hi = hi.reshape(B, 1, P + L)

    # Parameter prep (tiny, one-time, layout-only): pre-transpose / stack weights.
    wcatT = jnp.concatenate([jnp.asarray(W_wp, f32).T,
                             jnp.asarray(W_wi, f32).T], axis=0)      # (P+L, mid*in)
    bw0 = (jnp.asarray(b_wp, f32) + jnp.asarray(b_wi, f32)).reshape(1, mid * in_ch)
    weT = jnp.asarray(W_we, f32).T                                   # (mid, out*kk)
    bwe = jnp.asarray(b_we, f32).reshape(1, out_ch * kk)
    bcatT = jnp.concatenate([jnp.asarray(W_bp, f32).T,
                             jnp.asarray(W_bi, f32).T], axis=0)      # (P+L, out)
    bb0 = (jnp.asarray(b_bp, f32) + jnp.asarray(b_bi, f32)).reshape(1, out_ch)

    kernel = functools.partial(
        _hyper_embed_kernel,
        in_channels=in_ch, mid_channels=mid, out_channels=out_ch, kk=kk)

    w4, b3 = pl.pallas_call(
        kernel,
        out_shape=(
            jax.ShapeDtypeStruct((B, out_ch, in_ch, kk), f32),
            jax.ShapeDtypeStruct((B, 1, out_ch), f32),
        ),
        grid_spec=pltpu.PrefetchScalarGridSpec(
            num_scalar_prefetch=0,
            grid=(B,),
            in_specs=[
                pl.BlockSpec((1, 1, P + L), lambda b: (b, 0, 0)),
                pl.BlockSpec((P + L, mid * in_ch), lambda b: (0, 0)),
                pl.BlockSpec((1, mid * in_ch), lambda b: (0, 0)),
                pl.BlockSpec((mid, out_ch * kk), lambda b: (0, 0)),
                pl.BlockSpec((1, out_ch * kk), lambda b: (0, 0)),
                pl.BlockSpec((P + L, out_ch), lambda b: (0, 0)),
                pl.BlockSpec((1, out_ch), lambda b: (0, 0)),
            ],
            out_specs=(
                pl.BlockSpec((1, out_ch, in_ch, kk), lambda b: (b, 0, 0, 0)),
                pl.BlockSpec((1, 1, out_ch), lambda b: (b, 0, 0)),
            ),
            scratch_shapes=[pltpu.VMEM((in_ch, mid), f32)],
        ),
        compiler_params=pltpu.CompilerParams(
            dimension_semantics=("parallel",),
        ),
    )(hi, wcatT, bw0, weT, bwe, bcatT, bb0)

    # Free metadata reshapes only (no transpose passes over HBM).
    w = w4.reshape(*batch_shape, out_ch, in_ch, kh, kw)
    b = b3.reshape(*batch_shape, out_ch)
    return w, b


def _reference(h, index, params, dim_w):
    """Pure-JAX reference matching the PyTorch module exactly."""
    out_ch, in_ch, kh, kw = dim_w
    W_wp, b_wp = params["fc_w_param"]
    W_wi, b_wi = params["fc_w_index"]
    W_we, b_we = params["fc_w_embed"]
    W_bp, b_bp = params["fc_b_param"]
    W_bi, b_bi = params["fc_b_index"]
    mid = W_we.shape[1]

    w = (h @ W_wp.T + b_wp) + (index @ W_wi.T + b_wi)
    w = w.reshape(*h.shape[:-1], in_ch, mid)
    w = w @ W_we.T + b_we
    w = w.reshape(*w.shape[:-1], out_ch, kh, kw)
    w = jnp.swapaxes(w, -4, -3)                       # (*, out, in, kh, kw)
    b = (h @ W_bp.T + b_bp) + (index @ W_bi.T + b_bi)
    return w, b


if __name__ == "__main__":
    # Keep reference matmuls in full f32 so the comparison is tight.
    jax.config.update("jax_default_matmul_precision", "highest")

    # Small, module-consistent shapes.
    n_params = 6
    n_layers = 4
    dim_w = (8, 4, 3, 3)          # (out_channels, in_channels, kh, kw)
    mid_channels = 32
    batch = 2

    out_ch, in_ch, kh, kw = dim_w
    kk = kh * kw

    key = jax.random.PRNGKey(0)
    keys = jax.random.split(key, 12)

    def xavier(k, fan_out, fan_in):
        std = float(np.sqrt(2.0 / (fan_in + fan_out)))
        return jax.random.normal(k, (fan_out, fan_in), dtype=jnp.float32) * std

    def bias(k, fan_out, fan_in):
        bound = 1.0 / float(np.sqrt(fan_in))
        return jax.random.uniform(k, (fan_out,), minval=-bound, maxval=bound,
                                  dtype=jnp.float32)

    params = {
        "fc_w_param": (xavier(keys[0], mid_channels * in_ch, n_params),
                       bias(keys[1], mid_channels * in_ch, n_params)),
        "fc_w_index": (xavier(keys[2], mid_channels * in_ch, n_layers),
                       bias(keys[3], mid_channels * in_ch, n_layers)),
        "fc_w_embed": (xavier(keys[4], out_ch * kk, mid_channels),
                       bias(keys[5], out_ch * kk, mid_channels)),
        "fc_b_param": (xavier(keys[6], out_ch, n_params),
                       bias(keys[7], out_ch, n_params)),
        "fc_b_index": (xavier(keys[8], out_ch, n_layers),
                       bias(keys[9], out_ch, n_layers)),
    }

    h = jax.random.normal(keys[10], (batch, n_params), dtype=jnp.float32)
    index = jnp.zeros((n_layers,), jnp.float32).at[2].set(1.0)   # one-hot layer index

    w_out, b_out = hyper_conv2d_embedder(h, index, params, dim_w)
    w_out, b_out = jax.block_until_ready((w_out, b_out))

    w_ref, b_ref = _reference(h, index, params, dim_w)
    np.testing.assert_allclose(np.asarray(w_out), np.asarray(w_ref),
                               rtol=5e-5, atol=1e-5)
    np.testing.assert_allclose(np.asarray(b_out), np.asarray(b_ref),
                               rtol=5e-5, atol=1e-5)

    print("KERNEL_OK")
</pallas_src>

<mosaic_0001>
module attributes {stable_mosaic.version = 11 : i64} {
  func.func @_hyper_embed_kernel(%arg0: i32, %arg1: memref<1x1x10xf32, #tpu.memory_space<vmem>>, %arg2: memref<10x128xf32, #tpu.memory_space<vmem>>, %arg3: memref<1x128xf32, #tpu.memory_space<vmem>>, %arg4: memref<32x72xf32, #tpu.memory_space<vmem>>, %arg5: memref<1x72xf32, #tpu.memory_space<vmem>>, %arg6: memref<10x8xf32, #tpu.memory_space<vmem>>, %arg7: memref<1x8xf32, #tpu.memory_space<vmem>>, %arg8: memref<1x8x4x9xf32, #tpu.memory_space<vmem>>, %arg9: memref<1x1x8xf32, #tpu.memory_space<vmem>>, %arg10: memref<4x32xf32, #tpu.memory_space<vmem>>) attributes {dimension_semantics = [#tpu.dimension_semantics<parallel>], iteration_bounds = array<i64: 2>, scalar_prefetch = 0 : i64, scratch_operands = 1 : i64, tpu.core_type = #tpu.core_type<tc>, window_params = [{transform_indices = @transform_0, window_bounds = array<i64: 1, 1, 10>}, {pipeline_mode = #tpu.pipeline_mode<synchronous>, transform_indices = @transform_1, window_bounds = array<i64: 10, 128>}, {pipeline_mode = #tpu.pipeline_mode<synchronous>, transform_indices = @transform_2, window_bounds = array<i64: 1, 128>}, {pipeline_mode = #tpu.pipeline_mode<synchronous>, transform_indices = @transform_3, window_bounds = array<i64: 32, 72>}, {pipeline_mode = #tpu.pipeline_mode<synchronous>, transform_indices = @transform_4, window_bounds = array<i64: 1, 72>}, {pipeline_mode = #tpu.pipeline_mode<synchronous>, transform_indices = @transform_5, window_bounds = array<i64: 10, 8>}, {pipeline_mode = #tpu.pipeline_mode<synchronous>, transform_indices = @transform_6, window_bounds = array<i64: 1, 8>}, {transform_indices = @transform_7, window_bounds = array<i64: 1, 8, 4, 9>}, {transform_indices = @transform_8, window_bounds = array<i64: 1, 1, 8>}]} {
    %c0 = arith.constant 0 : index
    %c0_0 = arith.constant 0 : index
    %c0_1 = arith.constant 0 : index
    %0 = vector.load %arg1[%c0, %c0_0, %c0_1] : memref<1x1x10xf32, #tpu.memory_space<vmem>>, vector<1x1x10xf32>
    %1 = vector.shape_cast %0 : vector<1x1x10xf32> to vector<1x10xf32>
    %c0_2 = arith.constant 0 : index
    %c0_3 = arith.constant 0 : index
    %2 = vector.load %arg2[%c0_2, %c0_3] : memref<10x128xf32, #tpu.memory_space<vmem>>, vector<10x128xf32>
    %cst = arith.constant dense<0.000000e+00> : vector<1x128xf32>
    %3 = tpu.matmul %1, %2, %cst {dimension_numbers = #tpu.dot_dimension_numbers<[1], [0], [0], [1], [0, 0, 1, 1], [], []>, precision = #tpu.contract_precision<fp32>} : vector<1x10xf32>, vector<10x128xf32>, vector<1x128xf32> -> vector<1x128xf32>
    %c0_4 = arith.constant 0 : index
    %c0_5 = arith.constant 0 : index
    %4 = vector.load %arg3[%c0_4, %c0_5] : memref<1x128xf32, #tpu.memory_space<vmem>>, vector<1x128xf32>
    %5 = arith.addf %3, %4 : vector<1x128xf32>
    %6 = vector.extract_strided_slice %5 {offsets = [0, 0], sizes = [1, 32], strides = [1, 1]} : vector<1x128xf32> to vector<1x32xf32>
    %c0_6 = arith.constant 0 : index
    %c0_7 = arith.constant 0 : index
    %7 = vector.load %arg10[%c0_6, %c0_7] : memref<4x32xf32, #tpu.memory_space<vmem>>, vector<1x32xf32>
    tpu.vector_store %arg10[%c0_6, %c0_7], %6 {strides = array<i32>} : memref<4x32xf32, #tpu.memory_space<vmem>>, vector<1x32xf32>,
    %8 = vector.extract_strided_slice %5 {offsets = [0, 32], sizes = [1, 32], strides = [1, 1]} : vector<1x128xf32> to vector<1x32xf32>
    %c1 = arith.constant 1 : index
    %c0_8 = arith.constant 0 : index
    %9 = vector.load %arg10[%c1, %c0_8] : memref<4x32xf32, #tpu.memory_space<vmem>>, vector<1x32xf32>
    tpu.vector_store %arg10[%c1, %c0_8], %8 {strides = array<i32>} : memref<4x32xf32, #tpu.memory_space<vmem>>, vector<1x32xf32>,
    %10 = vector.extract_strided_slice %5 {offsets = [0, 64], sizes = [1, 32], strides = [1, 1]} : vector<1x128xf32> to vector<1x32xf32>
    %c2 = arith.constant 2 : index
    %c0_9 = arith.constant 0 : index
    %11 = vector.load %arg10[%c2, %c0_9] : memref<4x32xf32, #tpu.memory_space<vmem>>, vector<1x32xf32>
    tpu.vector_store %arg10[%c2, %c0_9], %10 {strides = array<i32>} : memref<4x32xf32, #tpu.memory_space<vmem>>, vector<1x32xf32>,
    %12 = vector.extract_strided_slice %5 {offsets = [0, 96], sizes = [1, 32], strides = [1, 1]} : vector<1x128xf32> to vector<1x32xf32>
    %c3 = arith.constant 3 : index
    %c0_10 = arith.constant 0 : index
    %13 = vector.load %arg10[%c3, %c0_10] : memref<4x32xf32, #tpu.memory_space<vmem>>, vector<1x32xf32>
    tpu.vector_store %arg10[%c3, %c0_10], %12 {strides = array<i32>} : memref<4x32xf32, #tpu.memory_space<vmem>>, vector<1x32xf32>,
    %c0_11 = arith.constant 0 : index
    %c0_12 = arith.constant 0 : index
    %14 = vector.load %arg10[%c0_11, %c0_12] : memref<4x32xf32, #tpu.memory_space<vmem>>, vector<4x32xf32>
    %c0_13 = arith.constant 0 : index
    %c0_14 = arith.constant 0 : index
    %15 = vector.load %arg4[%c0_13, %c0_14] : memref<32x72xf32, #tpu.memory_space<vmem>>, vector<32x72xf32>
    %cst_15 = arith.constant dense<0.000000e+00> : vector<4x72xf32>
    %16 = tpu.matmul %14, %15, %cst_15 {dimension_numbers = #tpu.dot_dimension_numbers<[1], [0], [0], [1], [0, 0, 1, 1], [], []>, precision = #tpu.contract_precision<fp32>} : vector<4x32xf32>, vector<32x72xf32>, vector<4x72xf32> -> vector<4x72xf32>
    %c0_16 = arith.constant 0 : index
    %c0_17 = arith.constant 0 : index
    %17 = vector.load %arg5[%c0_16, %c0_17] : memref<1x72xf32, #tpu.memory_space<vmem>>, vector<1x72xf32>
    %18 = vector.broadcast %17 : vector<1x72xf32> to vector<4x72xf32>
    %19 = arith.addf %16, %18 : vector<4x72xf32>
    %20 = vector.extract_strided_slice %19 {offsets = [0, 0], sizes = [4, 9], strides = [1, 1]} : vector<4x72xf32> to vector<4x9xf32>
    %c0_18 = arith.constant 0 : index
    %c0_19 = arith.constant 0 : index
    %c0_20 = arith.constant 0 : index
    %c0_21 = arith.constant 0 : index
    %21 = vector.load %arg8[%c0_18, %c0_19, %c0_20, %c0_21] : memref<1x8x4x9xf32, #tpu.memory_space<vmem>>, vector<1x1x4x9xf32>
    %22 = vector.shape_cast %21 : vector<1x1x4x9xf32> to vector<4x9xf32>
    %23 = vector.shape_cast %20 : vector<4x9xf32> to vector<1x1x4x9xf32>
    tpu.vector_store %arg8[%c0_18, %c0_19, %c0_20, %c0_21], %23 {strides = array<i32>} : memref<1x8x4x9xf32, #tpu.memory_space<vmem>>, vector<1x1x4x9xf32>,
    %24 = vector.extract_strided_slice %19 {offsets = [0, 9], sizes = [4, 9], strides = [1, 1]} : vector<4x72xf32> to vector<4x9xf32>
    %c0_22 = arith.constant 0 : index
    %c1_23 = arith.constant 1 : index
    %c0_24 = arith.constant 0 : index
    %c0_25 = arith.constant 0 : index
    %25 = vector.load %arg8[%c0_22, %c1_23, %c0_24, %c0_25] : memref<1x8x4x9xf32, #tpu.memory_space<vmem>>, vector<1x1x4x9xf32>
    %26 = vector.shape_cast %25 : vector<1x1x4x9xf32> to vector<4x9xf32>
    %27 = vector.shape_cast %24 : vector<4x9xf32> to vector<1x1x4x9xf32>
    tpu.vector_store %arg8[%c0_22, %c1_23, %c0_24, %c0_25], %27 {strides = array<i32>} : memref<1x8x4x9xf32, #tpu.memory_space<vmem>>, vector<1x1x4x9xf32>,
    %28 = vector.extract_strided_slice %19 {offsets = [0, 18], sizes = [4, 9], strides = [1, 1]} : vector<4x72xf32> to vector<4x9xf32>
    %c0_26 = arith.constant 0 : index
    %c2_27 = arith.constant 2 : index
    %c0_28 = arith.constant 0 : index
    %c0_29 = arith.constant 0 : index
    %29 = vector.load %arg8[%c0_26, %c2_27, %c0_28, %c0_29] : memref<1x8x4x9xf32, #tpu.memory_space<vmem>>, vector<1x1x4x9xf32>
    %30 = vector.shape_cast %29 : vector<1x1x4x9xf32> to vector<4x9xf32>
    %31 = vector.shape_cast %28 : vector<4x9xf32> to vector<1x1x4x9xf32>
    tpu.vector_store %arg8[%c0_26, %c2_27, %c0_28, %c0_29], %31 {strides = array<i32>} : memref<1x8x4x9xf32, #tpu.memory_space<vmem>>, vector<1x1x4x9xf32>,
    %32 = vector.extract_strided_slice %19 {offsets = [0, 27], sizes = [4, 9], strides = [1, 1]} : vector<4x72xf32> to vector<4x9xf32>
    %c0_30 = arith.constant 0 : index
    %c3_31 = arith.constant 3 : index
    %c0_32 = arith.constant 0 : index
    %c0_33 = arith.constant 0 : index
    %33 = vector.load %arg8[%c0_30, %c3_31, %c0_32, %c0_33] : memref<1x8x4x9xf32, #tpu.memory_space<vmem>>, vector<1x1x4x9xf32>
    %34 = vector.shape_cast %33 : vector<1x1x4x9xf32> to vector<4x9xf32>
    %35 = vector.shape_cast %32 : vector<4x9xf32> to vector<1x1x4x9xf32>
    tpu.vector_store %arg8[%c0_30, %c3_31, %c0_32, %c0_33], %35 {strides = array<i32>} : memref<1x8x4x9xf32, #tpu.memory_space<vmem>>, vector<1x1x4x9xf32>,
    %36 = vector.extract_strided_slice %19 {offsets = [0, 36], sizes = [4, 9], strides = [1, 1]} : vector<4x72xf32> to vector<4x9xf32>
    %c0_34 = arith.constant 0 : index
    %c4 = arith.constant 4 : index
    %c0_35 = arith.constant 0 : index
    %c0_36 = arith.constant 0 : index
    %37 = vector.load %arg8[%c0_34, %c4, %c0_35, %c0_36] : memref<1x8x4x9xf32, #tpu.memory_space<vmem>>, vector<1x1x4x9xf32>
    %38 = vector.shape_cast %37 : vector<1x1x4x9xf32> to vector<4x9xf32>
    %39 = vector.shape_cast %36 : vector<4x9xf32> to vector<1x1x4x9xf32>
    tpu.vector_store %arg8[%c0_34, %c4, %c0_35, %c0_36], %39 {strides = array<i32>} : memref<1x8x4x9xf32, #tpu.memory_space<vmem>>, vector<1x1x4x9xf32>,
    %40 = vector.extract_strided_slice %19 {offsets = [0, 45], sizes = [4, 9], strides = [1, 1]} : vector<4x72xf32> to vector<4x9xf32>
    %c0_37 = arith.constant 0 : index
    %c5 = arith.constant 5 : index
    %c0_38 = arith.constant 0 : index
    %c0_39 = arith.constant 0 : index
    %41 = vector.load %arg8[%c0_37, %c5, %c0_38, %c0_39] : memref<1x8x4x9xf32, #tpu.memory_space<vmem>>, vector<1x1x4x9xf32>
    %42 = vector.shape_cast %41 : vector<1x1x4x9xf32> to vector<4x9xf32>
    %43 = vector.shape_cast %40 : vector<4x9xf32> to vector<1x1x4x9xf32>
    tpu.vector_store %arg8[%c0_37, %c5, %c0_38, %c0_39], %43 {strides = array<i32>} : memref<1x8x4x9xf32, #tpu.memory_space<vmem>>, vector<1x1x4x9xf32>,
    %44 = vector.extract_strided_slice %19 {offsets = [0, 54], sizes = [4, 9], strides = [1, 1]} : vector<4x72xf32> to vector<4x9xf32>
    %c0_40 = arith.constant 0 : index
    %c6 = arith.constant 6 : index
    %c0_41 = arith.constant 0 : index
    %c0_42 = arith.constant 0 : index
    %45 = vector.load %arg8[%c0_40, %c6, %c0_41, %c0_42] : memref<1x8x4x9xf32, #tpu.memory_space<vmem>>, vector<1x1x4x9xf32>
    %46 = vector.shape_cast %45 : vector<1x1x4x9xf32> to vector<4x9xf32>
    %47 = vector.shape_cast %44 : vector<4x9xf32> to vector<1x1x4x9xf32>
    tpu.vector_store %arg8[%c0_40, %c6, %c0_41, %c0_42], %47 {strides = array<i32>} : memref<1x8x4x9xf32, #tpu.memory_space<vmem>>, vector<1x1x4x9xf32>,
    %48 = vector.extract_strided_slice %19 {offsets = [0, 63], sizes = [4, 9], strides = [1, 1]} : vector<4x72xf32> to vector<4x9xf32>
    %c0_43 = arith.constant 0 : index
    %c7 = arith.constant 7 : index
    %c0_44 = arith.constant 0 : index
    %c0_45 = arith.constant 0 : index
    %49 = vector.load %arg8[%c0_43, %c7, %c0_44, %c0_45] : memref<1x8x4x9xf32, #tpu.memory_space<vmem>>, vector<1x1x4x9xf32>
    %50 = vector.shape_cast %49 : vector<1x1x4x9xf32> to vector<4x9xf32>
    %51 = vector.shape_cast %48 : vector<4x9xf32> to vector<1x1x4x9xf32>
    tpu.vector_store %arg8[%c0_43, %c7, %c0_44, %c0_45], %51 {strides = array<i32>} : memref<1x8x4x9xf32, #tpu.memory_space<vmem>>, vector<1x1x4x9xf32>,
    %c0_46 = arith.constant 0 : index
    %c0_47 = arith.constant 0 : index
    %52 = vector.load %arg6[%c0_46, %c0_47] : memref<10x8xf32, #tpu.memory_space<vmem>>, vector<10x8xf32>
    %cst_48 = arith.constant dense<0.000000e+00> : vector<1x8xf32>
    %53 = tpu.matmul %1, %52, %cst_48 {dimension_numbers = #tpu.dot_dimension_numbers<[1], [0], [0], [1], [0, 0, 1, 1], [], []>, precision = #tpu.contract_precision<fp32>} : vector<1x10xf32>, vector<10x8xf32>, vector<1x8xf32> -> vector<1x8xf32>
    %c0_49 = arith.constant 0 : index
    %c0_50 = arith.constant 0 : index
    %54 = vector.load %arg7[%c0_49, %c0_50] : memref<1x8xf32, #tpu.memory_space<vmem>>, vector<1x8xf32>
    %55 = arith.addf %53, %54 : vector<1x8xf32>
    %c0_51 = arith.constant 0 : index
    %c0_52 = arith.constant 0 : index
    %c0_53 = arith.constant 0 : index
    %56 = vector.load %arg9[%c0_51, %c0_52, %c0_53] : memref<1x1x8xf32, #tpu.memory_space<vmem>>, vector<1x1x8xf32>
    %57 = vector.shape_cast %56 : vector<1x1x8xf32> to vector<1x8xf32>
    %58 = vector.shape_cast %55 : vector<1x8xf32> to vector<1x1x8xf32>
    tpu.vector_store %arg9[%c0_51, %c0_52, %c0_53], %58 {strides = array<i32>} : memref<1x1x8xf32, #tpu.memory_space<vmem>>, vector<1x1x8xf32>,
    return
  }
  func.func @transform_0(%arg0: i32) -> (i32, i32, i32) {
    %c0_i32 = arith.constant 0 : i32
    %c0_i32_0 = arith.constant 0 : i32
    %c0_i32_1 = arith.constant 0 : i32
    return %arg0, %c0_i32, %c0_i32_0 : i32, i32, i32
  }
  func.func @transform_1(%arg0: i32) -> (i32, i32) {
    %c0_i32 = arith.constant 0 : i32
    %c0_i32_0 = arith.constant 0 : i32
    %c0_i32_1 = arith.constant 0 : i32
    return %c0_i32, %c0_i32_0 : i32, i32
  }
  func.func @transform_2(%arg0: i32) -> (i32, i32) {
    %c0_i32 = arith.constant 0 : i32
    %c0_i32_0 = arith.constant 0 : i32
    %c0_i32_1 = arith.constant 0 : i32
    return %c0_i32, %c0_i32_0 : i32, i32
  }
  func.func @transform_3(%arg0: i32) -> (i32, i32) {
    %c0_i32 = arith.constant 0 : i32
    %c0_i32_0 = arith.constant 0 : i32
    %c0_i32_1 = arith.constant 0 : i32
    return %c0_i32, %c0_i32_0 : i32, i32
  }
  func.func @transform_4(%arg0: i32) -> (i32, i32) {
    %c0_i32 = arith.constant 0 : i32
    %c0_i32_0 = arith.constant 0 : i32
    %c0_i32_1 = arith.constant 0 : i32
    return %c0_i32, %c0_i32_0 : i32, i32
  }
  func.func @transform_5(%arg0: i32) -> (i32, i32) {
    %c0_i32 = arith.constant 0 : i32
    %c0_i32_0 = arith.constant 0 : i32
    %c0_i32_1 = arith.constant 0 : i32
    return %c0_i32, %c0_i32_0 : i32, i32
  }
  func.func @transform_6(%arg0: i32) -> (i32, i32) {
    %c0_i32 = arith.constant 0 : i32
    %c0_i32_0 = arith.constant 0 : i32
    %c0_i32_1 = arith.constant 0 : i32
    return %c0_i32, %c0_i32_0 : i32, i32
  }
  func.func @transform_7(%arg0: i32) -> (i32, i32, i32, i32) {
    %c0_i32 = arith.constant 0 : i32
    %c0_i32_0 = arith.constant 0 : i32
    %c0_i32_1 = arith.constant 0 : i32
    %c0_i32_2 = arith.constant 0 : i32
    return %arg0, %c0_i32, %c0_i32_0, %c0_i32_1 : i32, i32, i32, i32
  }
  func.func @transform_8(%arg0: i32) -> (i32, i32, i32) {
    %c0_i32 = arith.constant 0 : i32
    %c0_i32_0 = arith.constant 0 : i32
    %c0_i32_1 = arith.constant 0 : i32
    return %arg0, %c0_i32, %c0_i32_0 : i32, i32, i32
  }
}

</mosaic_0001>

<bundles_post_ra>
// kernel: tpu_custom_call.1
= control target key start
LH: loop header
LB: loop body
LE: loop exit
PB: predicated region body
PF: predicated region fallthrough
CT: control target
= control target key end

     0   :  { %s3083_s0 = inlined_call_operand.vmem [shape: f32[2,1,10], index: 0, kind: input, shape index: {}]   ;;  %s3084_s1 = inlined_call_operand.hbm [shape: f32[10,128], index: 1, kind: input, shape index: {}]   ;;  %s3085_s2 = inlined_call_operand.hbm [shape: f32[1,128], index: 2, kind: input, shape index: {}]   ;;  %s3086_s3 = inlined_call_operand.vmem [shape: f32[32,72], index: 3, kind: input, shape index: {}]   ;;  %s3087_s4 = inlined_call_operand.hbm [shape: f32[1,72], index: 4, kind: input, shape index: {}]   ;;  %s3088_s5 = inlined_call_operand.vmem [shape: f32[10,8], index: 5, kind: input, shape index: {}]   ;;  %s3089_s6 = inlined_call_operand.vmem [shape: f32[1,8], index: 6, kind: input, shape index: {}]   ;;  %s3090_s7 = inlined_call_operand.hbm [shape: f32[2,8,4,9], index: 7, kind: output, shape index: {0}]   ;;  %s3091_s8 = inlined_call_operand.hbm [shape: f32[2,1,8], index: 8, kind: output, shape index: {1}]  }
   0x1   :  { %3096 = sst [smem:[#allocation18_spill]] %s3085_s2 }
   0x2   :  { %14 = vsyncpa [#allocation4], 0 }
   0x3   :  { %15 = vsyncpa [#allocation7], 0 }
   0x4   :  { %16 = vsyncpa [#allocation5], 0 }
   0x5   :  { %18 = vsyncpa [#allocation5 + $0x1], 0 }
   0x6   :  { %19 = vsyncpa [#allocation11], 0 }
   0x7   :  { %21 = vsyncpa [#allocation11 + $0x1], 0  ;;  %s2681_s27 = smov 0   ;;  %s2683_s28 = smov 0  }
   0x8   :  { %s2685_s29 = smov 0   ;;  %s2687_s30 = smov 0  }
   0x9 LB: > { %3097 = sst [smem:[#allocation16_spill]] %s2609_s29  ;;  %s2702_s9 = sadd.s32 4294967295, %s2613_s30   ;;  %s2613_s30 = sphi %s2687_s30, %s3116_s30   ;;  %s2609_s29 = sphi %s2685_s29, %s3113_s29   ;;  %s2605_s28 = sphi %s2683_s28, %s3115_s28   ;;  %s2601_s27 = sphi %s2681_s27, %s3114_s27  }
   0xa   : > { %s1989_s10 = sadd.s32 4294967294, %s2613_s30   ;;  %s2706_s11 = sadd.s32 1, %s2613_s30  }
   0xb   : > { %s186_s12 = sadd.s32 1, %s2609_s29  ;;  %s183_s13 = ssub.s32 %s2613_s30, %s2706_s11 }
   0xc   : > { %p196_p0 = scmp.ne.s32.totalorder %s2609_s29, %s2605_s28  ;;  %p184_p1 = scmp.eq.s32.totalorder %s183_s13, 0 }
   0xd   : > { %p197_p2 = scmp.eq.s32.totalorder %s2702_s9, 1  ;;  %p202_p3 = scmp.ne.s32.totalorder %s2605_s28, %s2601_s27 }
   0xe   : > { %p203_p4 = scmp.eq.s32.totalorder %s1989_s10, 1  ;;  %p1990_p7 = scmp.ge.s32.totalorder %s2613_s30, 1 }
   0xf   : > { %s2717_s14 = scalar_select %p184_p1, %s2609_s29, %s186_s12  }
  0x10   : > { %p2719_p5 = por %p197_p2, %p196_p0  ;;  %p2723_p6 = por %p203_p4, %p202_p3 }
  0x11   : > { %3098 = sst [smem:[#allocation17_spill]] %s2717_s14  ;;  %p236_p8 = scmp.lt.s32.totalorder %s2613_s30, 3 }
  0x12   : > { %s3099_s15 = scalar_select %p2719_p5, 1, 0 }
  0x13   : > { %s3100_s16 = scalar_select %p2723_p6, 1, 0 }
  0x14   : > { %p3092_p9 = scmp.eq.s32.totalorder %s2702_s9, 0  ;;  %p2730_p10 = pnand %p1990_p7, %p236_p8 }
  0x15   : > { %s2615_s18 = smov [#allocation6]   ;;  %s2616_s20 = smov [#allocation3]  }
  0x16   : > { %s3101_s17 = scalar_select %p2730_p10, 1, 0 }
  0x17   : > { %s262_s19 = sshll.u32 %s2615_s18, 4  ;;  %p2352_p11 = pneg %p2730_p10  ;;  %s263_s19 = int_to_ptr.vmem [resolvable:$true] %s262_s19 }
  0x18   : > { %s248_s21 = sshll.u32 %s2616_s20, 4  ;;  %s2617_s23 = smov [#allocation8]   ;;  %s2742_s21 = int_to_ptr.vmem [resolvable:$true] %s248_s21 }
  0x19   : > { %p2738_p12 = pnand %p3092_p9, %p2352_p11  ;;  %s2744_s24 = sshll.u32 %s2617_s23, 4  ;;  %s277_s24 = int_to_ptr.vmem [resolvable:$true] %s2744_s24 }
  0x1a   : > { %s3103_s2 = sld [smem:[#allocation18_spill]] }
  0x1b   : > { %p2754_p0 = pneg %p2738_p12 }
  0x20   : > { %s2427_s10 = scalar_lea.hbm %s3103_s2, 16 }
  0x21   : > { %p2428_p13 = scmp.ne.s32.totalorder %s3103_s2, %s2427_s10  ;;  %p2434_p3 = scmp.lt.u32.totalorder %s2427_s10, %s3103_s2 }
  0x23   : > { %p2430_p1 = pnand %p2754_p0, %p2428_p13 }
  0x25   : > { %p2431_p2 = pneg %p2430_p1 }
  0x27   : > { %p2436_p4 = pnand %p2434_p3, %p2431_p2 }
  0x29   : > { %2439 = shalt.err (!%p2436_p4)
}
  0x2a   : > { %s2440_s25 = scalar_lea.vmem %s263_s19, 16  ;;  %s2447_s26 = scalar_lea.vmem %s263_s19, 32 }
  0x2b   : > { %p2441_p7 = scmp.ne.s32.totalorder %s263_s19, %s2440_s25  ;;  %p2448_p9 = scmp.lt.s32.totalorder %s263_s19, %s263_s19 }
  0x2c   : > { %p2449_p6 = scmp.lt.s32.totalorder %s2447_s26, %s2440_s25 }
  0x2d   : > { %p2443_p8 = pnand %p2441_p7, %p2754_p0 }
  0x2e   : > { %p2450_p5 = por %p2449_p6, %p2448_p9 }
  0x2f   : > { %p2444_p11 = pneg %p2443_p8 }
  0x31   : > { %p2451_p10 = pnand %p2450_p5, %p2444_p11 }
  0x33   : > { %2454 = shalt.err (!%p2451_p10)
}
  0x34   : > { %2358 = dma.hbm_to_vmem [thread:$0]  (!%p2738_p12), %s3103_s2, 16, %s263_s19, [#allocation7]  }
  0x35   : > { %s2455_s23 = scalar_lea.hbm %s3084_s1, 256 }
  0x36   : > { %p2456_p13 = scmp.ne.s32.totalorder %s3084_s1, %s2455_s23  ;;  %p2462_p5 = scmp.lt.u32.totalorder %s2455_s23, %s3084_s1 }
  0x38   : > { %p2458_p1 = pnand %p2456_p13, %p2754_p0 }
  0x3a   : > { %p2459_p6 = pneg %p2458_p1 }
  0x3c   : > { %p2464_p9 = pnand %p2462_p5, %p2459_p6 }
  0x3e   : > { %2467 = shalt.err (!%p2464_p9)
}
  0x3f   : > { %s2468_s19 = scalar_lea.vmem %s2742_s21, 256  ;;  %p2476_p4 = scmp.lt.s32.totalorder %s2742_s21, %s2742_s21 }
  0x40   : > { %p2469_p10 = scmp.ne.s32.totalorder %s2742_s21, %s2468_s19  ;;  %p2477_p7 = scmp.lt.s32.totalorder %s2468_s19, %s2468_s19 }
  0x42   : > { %p2471_p2 = pnand %p2469_p10, %p2754_p0  ;;  %p2478_p8 = por %p2477_p7, %p2476_p4 }
  0x44   : > { %p2472_p3 = pneg %p2471_p2 }
  0x46   : > { %p2479_p11 = pnand %p2478_p8, %p2472_p3 }
  0x48   : > { %2482 = shalt.err (!%p2479_p11)
}
  0x49   : > { %s2618_s29 = smov 128   ;;  %s2619_s14 = smov 8  }
  0x4a   : > { %2355 = dma.hbm_to_vmem [thread:$0]  (!%p2738_p12), %s3084_s1, 256, %s2742_s21, [#allocation4], %s2618_s29, %s2618_s29, %s2619_s14  }
  0x4b   : > { %s2483_s23 = scalar_lea.hbm %s3087_s4, 16 }
  0x4c   : > { %p2484_p13 = scmp.ne.s32.totalorder %s3087_s4, %s2483_s23  ;;  %p2490_p5 = scmp.lt.u32.totalorder %s2483_s23, %s3087_s4 }
  0x4e   : > { %p2486_p1 = pnand %p2484_p13, %p2754_p0 }
  0x50   : > { %p2487_p6 = pneg %p2486_p1 }
  0x52   : > { %p2492_p9 = pnand %p2490_p5, %p2487_p6 }
  0x54   : > { %2495 = shalt.err (!%p2492_p9)
}
  0x55   : > { %s2496_s12 = scalar_lea.vmem %s277_s24, 16  ;;  %s2503_s21 = scalar_lea.vmem %s277_s24, 32 }
  0x56   : > { %p2497_p10 = scmp.ne.s32.totalorder %s277_s24, %s2496_s12  ;;  %p2504_p4 = scmp.lt.s32.totalorder %s277_s24, %s277_s24 }
  0x57   : > { %p2505_p7 = scmp.lt.s32.totalorder %s2503_s21, %s2496_s12 }
  0x58   : > { %p2499_p2 = pnand %p2497_p10, %p2754_p0 }
  0x59   : > { %p2506_p8 = por %p2505_p7, %p2504_p4 }
  0x5a   : > { %p2500_p3 = pneg %p2499_p2 }
  0x5c   : > { %p2507_p11 = pnand %p2506_p8, %p2500_p3 }
  0x5e   : > { %2510 = shalt.err (!%p2507_p11)
}
  0x5f   : > { %2361 = dma.hbm_to_vmem [thread:$0]  (!%p2738_p12), %s3087_s4, 16, %s277_s24, [#allocation7]  }
  0x60   : > { %p3105_p13 = scmp.ne.s32.totalorder %s3101_s17, 0 }
  0x61   : > { %p3106_p1 = scmp.eq.s32.totalorder (!%p3105_p13), %s2702_s9, 0 }
  0x62   : > { %301 = sbr.rel (%p3105_p13) target bundleno = 926 (0x39e), region = 48 }
  0x69   : > { %2584 = dma.done.wait (%p3106_p1), [#allocation4], 256   ;;  %p3107_p0 = pmov %p3106_p1 }
  0x6b   : > { %2586 = vsyncadd (%p3107_p0), [#allocation4], 4294967040  ;;  %p3108_p6 = pmov %p3107_p0 }
  0x6c   : > { %p3109_p5 = pmov %p3107_p0 }
  0x6d   : > { %2588 = dma.done.wait (%p3108_p6), [#allocation7], 32  }
  0x6e   : > { %2590 = vsyncadd (%p3109_p5), [#allocation7], 4294967264  ;;  %v2620_v0 = vmov 0.0|0.0   ;;  %vm2621_vm0 = vmmov 0   ;;  %v2622_v1 = vmov 0.0   ;;  %p345_p12 = scmp.lt.s32.totalorder %s2702_s9, 1 }
  0x6f   : > { %2231 = vmatprep.subr.bf16.mxu0 %v2620_v0  ;;  %2085 = vmatprep.mubr.msk.f32.mxu0 %vm2621_vm0, %v2622_v1  ;;  %vm356_vm1 = vcmask 1041408   ;;  %vm352_vm2 = vcmask 80896   ;;  %v349_v2 = vld [vmem:[#allocation3] sm:$0xff]  ;;  %v350_v3 = vld [vmem:[#allocation3 + $0x8] sm:$0x3]  ;;  %v837_v28 = vld [vmem:[%s3086_s3 + $0x10] sm:$0xff] }
  0x70   : > { %2249 = vmatprep.subr.bf16.mxu1 %v2620_v0  ;;  %2131 = vmatprep.mubr.msk.f32.mxu1 %vm2621_vm0, %v2622_v1  ;;  %s346_s2 = scalar_select %p345_p12, %s2702_s9, 1  ;;  %v358_v4 = vsel %vm356_vm1, %v350_v3, 0  ;;  %v361_v5 = vand.u32 4294901760, %v349_v2  ;;  %v835_v26 = vld [vmem:[%s3086_s3] sm:$0xff]  ;;  %v836_v27 = vld [vmem:[%s3086_s3 + $0x8] sm:$0xff]  ;;  %v838_v31 = vld [vmem:[%s3086_s3 + $0x18] sm:$0xff] }
  0x71   : > { %v364_v7 = vand.u32 4294901760, %v358_v4  ;;  %v851_v29 = vand.u32 4294901760, %v835_v26  ;;  %v854_v30 = vand.u32 4294901760, %v836_v27  ;;  %v857_v32 = vand.u32 4294901760, %v837_v28  ;;  %v351_v38 = vld [vmem:[#allocation6] sm:$0x1] }
  0x72   : > { %s347_s24 = scalar_lea.vmem %s3083_s0, %s346_s2  ;;  %v439_v9 = vsub.f32 %v349_v2, %v361_v5  ;;  %v860_v33 = vand.u32 4294901760, %v838_v31  ;;  %vm819_vm3 = vcmask 253952   ;;  %s2623_s12 = smov 32   ;;  %v1374_v62 = vld [vmem:[%s3088_s5 + $0x8] sm:$0x3]  ;;  %v1373_v2 = vld [vmem:[%s3088_s5] sm:$0xff] }
  0x73   : > { %v348_v6 = vld [vmem:[%s347_s24] sm:$0x1]  ;;  %v2232_v11 = vpack.c.bf16 %v364_v7, %v361_v5  ;;  %v446_v12 = vsub.f32 %v358_v4, %v364_v7  ;;  %v2882_v34 = vpack.c.bf16 %v854_v30, %v851_v29  ;;  %v2884_v35 = vsub.f32 %v835_v26, %v851_v29  ;;  %s2624_s21 = smov 96   ;;  %s2625_s29 = smov 64  }
  0x74   : > { %v354_v8 = vsel %vm352_vm2, %v348_v6, 0  ;;  %v440_v14 = vand.u32 4294901760, %v439_v9  ;;  %v2886_v36 = vsub.f32 %v836_v27, %v854_v30  ;;  %v2888_v37 = vsub.f32 %v837_v28, %v857_v32  ;;  %v1375_v29 = vld [vmem:[%s3089_s6] sm:$0x1]  ;;  %s2985_s13 = sand.u32 1, %s2605_s28   ;;  %s2011_s23 = sshll.u32 %s2702_s9, 4 }
  0x75   : > { %v2834_v10 = vand.u32 4294901760, %v354_v8  ;;  %2233 = vmatpush3.bf16.msra.mxu0 %v2232_v11  ;;  %v447_v15 = vand.u32 4294901760, %v446_v12  ;;  %v2238_v24 = vpack.c.bf16 %v446_v12, %v439_v9  ;;  %v2890_v39 = vsub.f32 %v838_v31, %v860_v33  ;;  %2251 = vmatpush3.bf16.msra.mxu1 %v2882_v34  ;;  %s344_s10 = scalar_lea.vmem [#allocation10], %s2985_s13  ;;  %s1999_s20 = sshll.u32 %s2985_s13, 5 }
  0x76   : > { %2234 = vmatprep.subr.bf16.mxu0 %v2620_v0  ;;  %v441_v17 = vsub.f32 %v439_v9, %v440_v14  ;;  %2252 = vmatprep.subr.bf16.mxu1 %v2620_v0  ;;  %v2894_v41 = vpack.c.bf16 %v860_v33, %v857_v32  ;;  %v932_v44 = vand.u32 4294901760, %v2884_v35  ;;  %v939_v45 = vand.u32 4294901760, %v2886_v36  ;;  %s2626_s25 = smov 110   ;;  %s2627_s26 = smov 119  }
  0x77   : > { %v2837_v13 = vsub.f32 %v354_v8, %v2834_v10  ;;  %v448_v18 = vsub.f32 %v446_v12, %v447_v15  ;;  %v2244_v25 = vpack.c.bf16 %v447_v15, %v440_v14  ;;  %v946_v50 = vand.u32 4294901760, %v2888_v37  ;;  %s2990_s19 = scalar_lea.vmem [#allocation9], %s1999_s20  ;;  %s2997_s14 = scalar_lea.hbm %s3091_s8, %s2011_s23 }
  0x78   : > { %v442_v20 = vand.u32 4294901760, %v441_v17  ;;  %v933_v46 = vsub.f32 %v2884_v35, %v932_v44  ;;  %v940_v47 = vsub.f32 %v2886_v36, %v939_v45  ;;  %v953_v51 = vand.u32 4294901760, %v2890_v39  ;;  %s1874_s2 = sshll.u32 %s344_s10, 4  ;;  %s1846_s17 = scalar_lea.sflag [#allocation11], %s2985_s13  ;;  %s1875_s2 = int_to_ptr.vmem [resolvable:$true] %s1874_s2 }
  0x79   : > { %v2840_v16 = vand.u32 4294901760, %v2837_v13  ;;  %v449_v21 = vand.u32 4294901760, %v448_v18  ;;  %2254 = vmatpush3.bf16.msra.mxu1 %v2894_v41  ;;  %v947_v53 = vsub.f32 %v2888_v37, %v946_v50  ;;  %v2262_v58 = vpack.c.bf16 %v2886_v36, %v2884_v35  ;;  %s2511_s22 = scalar_lea.vmem %s1875_s2, 16  ;;  %p3110_p10 = scmp.ne.s32.totalorder %s3099_s15, 0 }
  0x7a   : > { %2255 = vmatprep.subr.bf16.mxu1 %v2620_v0  ;;  %v934_v48 = vand.u32 4294901760, %v933_v46  ;;  %v941_v49 = vand.u32 4294901760, %v940_v47  ;;  %v954_v54 = vsub.f32 %v2890_v39, %v953_v51  ;;  %v2265_v59 = vpack.c.bf16 %v2890_v39, %v2888_v37  ;;  %p2512_p9 = scmp.ne.s32.totalorder %s1875_s2, %s2511_s22  ;;  %s2628_s24 = smov [#allocation10]  }
  0x7b   : > { %v430_v19 = vsub.f32 %v2837_v13, %v2840_v16  ;;  %v2235_v23 = vpack.c.bf16 %v449_v21, %v442_v20  ;;  %v948_v55 = vand.u32 4294901760, %v947_v53  ;;  %v2914_v60 = vpack.c.bf16 %v939_v45, %v932_v44  ;;  %s2515_s18 = sshll.u32 %s2628_s24, 4  ;;  %s2516_s18 = int_to_ptr.vmem [resolvable:$false] %s2515_s18 }
  0x7c   : > { %v2906_v52 = vpack.c.bf16 %v941_v49, %v934_v48  ;;  %v955_v56 = vand.u32 4294901760, %v954_v54  ;;  %v2916_v61 = vpack.c.bf16 %v953_v51, %v946_v50  ;;  %v1377_v63 = vsel %vm356_vm1, %v1374_v62, 0  ;;  %p2513_p2 = pnand %p2512_p9, %p3110_p10  ;;  %s2517_s20 = scalar_lea.vmem %s2516_s18, 32 }
  0x7d   : > { %v2845_v22 = vand.u32 4294901760, %v430_v19  ;;  %v1383_v3 = vand.u32 4294901760, %v1377_v63  ;;  %v1380_v4 = vand.u32 4294901760, %v1373_v2  ;;  %vm846_vm4 = vcmask 261120   ;;  %p2518_p4 = scmp.lt.s32.totalorder %s1875_s2, %s2516_s18  ;;  %p2519_p7 = scmp.lt.s32.totalorder %s2517_s20, %s2511_s22 }
  0x7e   : > { %v2259_v57 = vpack.c.bf16 %v955_v56, %v948_v55  ;;  %vm1838_vm5 = vcmask 57344   ;;  %vm1335_vm6 = vcmask 68608   ;;  %p2514_p3 = pneg %p2513_p2 }
  0x7f   : > { %2086 = vmatmul.mubr.f32.vlgmr.msra.gmra.mrb[0].mxu0 %v2845_v22  ;;  %v1465_v5 = vsub.f32 %v1377_v63, %v1383_v3  ;;  %v2286_v6 = vpack.c.bf16 %v1383_v3, %v1380_v4  ;;  %v1458_v7 = vsub.f32 %v1373_v2, %v1380_v4  ;;  %p2520_p8 = por %p2519_p7, %p2518_p4 }
  0x80   : > { %2236 = vmatpush3.bf16.msra.mxu0 %v2235_v23  ;;  %2092 = vmatprep.mubr.msk.f32.mxu0 %vm2621_vm0, %v2622_v1 }
  0x81   : > { %2237 = vmatprep.subr.bf16.mxu0 %v2620_v0  ;;  %v1466_v8 = vand.u32 4294901760, %v1465_v5  ;;  %v1459_v9 = vand.u32 4294901760, %v1458_v7  ;;  %v2292_v18 = vpack.c.bf16 %v1465_v5, %v1458_v7  ;;  %p2521_p11 = pnand %p2520_p8, %p2514_p3 }
  0x83   : > { %v1460_v12 = vsub.f32 %v1458_v7, %v1459_v9  ;;  %v2298_v19 = vpack.c.bf16 %v1466_v8, %v1459_v9 }
  0x85   : > { %v1461_v15 = vand.u32 4294901760, %v1460_v12 }
  0x87   : > { %2093 = vmatmul.mubr.f32.vlgmr.msra.gmra.mrb[0].mxu0 %v2834_v10 }
  0x88   : > { %2239 = vmatpush3.bf16.msra.mxu0 %v2238_v24  ;;  %2099 = vmatprep.mubr.msk.f32.mxu0 %vm2621_vm0, %v2622_v1 }
  0x89   : > { %2240 = vmatprep.subr.bf16.mxu0 %v2620_v0 }
  0x8f   : > { %2100 = vmatmul.mubr.f32.vlgmr.msra.gmra.mrb[0].mxu0 %v2837_v13 }
  0x90   : > { %2242 = vmatpush3.bf16.msra.mxu0 %v2232_v11  ;;  %2106 = vmatprep.mubr.msk.f32.mxu0 %vm2621_vm0, %v2622_v1 }
  0x91   : > { %2243 = vmatprep.subr.bf16.mxu0 %v2620_v0 }
  0x97   : > { %2107 = vmatmul.mubr.f32.vlgmr.msra.gmra.mrb[0].mxu0 %v2840_v16 }
  0x98   : > { %2245 = vmatpush3.bf16.msra.mxu0 %v2244_v25  ;;  %2113 = vmatprep.mubr.msk.f32.mxu0 %vm2621_vm0, %v2622_v1 }
  0x99   : > { %2246 = vmatprep.subr.bf16.mxu0 %v2620_v0 }
  0x9f   : > { %2114 = vmatmul.mubr.f32.vlgmr.msra.gmra.mrb[0].mxu0 %v2834_v10 }
  0xa0   : > { %2248 = vmatpush3.bf16.msra.mxu0 %v2232_v11  ;;  %2120 = vmatprep.mubr.msk.f32.mxu0 %vm2621_vm0, %v2622_v1  ;;  %v1467_v11 = vsub.f32 %v1465_v5, %v1466_v8 }
  0xa1   : > { %2285 = vmatprep.subr.bf16.mxu0 %v2620_v0 }
  0xa2   : > { %v1468_v14 = vand.u32 4294901760, %v1467_v11 }
  0xa4   : > { %v2289_v17 = vpack.c.bf16 %v1468_v14, %v1461_v15 }
  0xa7   : > { %2121 = vmatmul.mubr.f32.vlgmr.msra.gmra.mrb[0].mxu0 %v2834_v10 }
  0xa8   : > { %2193 = vmatprep.mubr.msk.f32.mxu0 %vm2621_vm0, %v2622_v1  ;;  %2287 = vmatpush3.bf16.msra.mxu0 %v2286_v6 }
  0xa9   : > { %2288 = vmatprep.subr.bf16.mxu0 %v2620_v0 }
  0xab   : > { %2194 = vmatmul.mubr.f32.vlgmr.msra.gmra.mrb[2].mxu0 %v2845_v22 }
  0xac   : > { %2200 = vmatprep.mubr.msk.f32.mxu0 %vm2621_vm0, %v2622_v1  ;;  %2290 = vmatpush3.bf16.msra.mxu0 %v2289_v17 }
  0xad   : > { %2291 = vmatprep.subr.bf16.mxu0 %v2620_v0 }
  0xb3   : > { %2201 = vmatmul.mubr.f32.vlgmr.msra.gmra.mrb[2].mxu0 %v2834_v10 }
  0xb4   : > { %2293 = vmatpush3.bf16.msra.mxu0 %v2292_v18  ;;  %2207 = vmatprep.mubr.msk.f32.mxu0 %vm2621_vm0, %v2622_v1 }
  0xb5   : > { %2294 = vmatprep.subr.bf16.mxu0 %v2620_v0 }
  0xbb   : > { %2208 = vmatmul.mubr.f32.vlgmr.msra.gmra.mrb[2].mxu0 %v2837_v13 }
  0xbc   : > { %2296 = vmatpush3.bf16.msra.mxu0 %v2286_v6  ;;  %2214 = vmatprep.mubr.msk.f32.mxu0 %vm2621_vm0, %v2622_v1 }
  0xbd   : > { %2297 = vmatprep.subr.bf16.mxu0 %v2620_v0 }
  0xc3   : > { %2215 = vmatmul.mubr.f32.vlgmr.msra.gmra.mrb[2].mxu0 %v2840_v16 }
  0xc4   : > { %2299 = vmatpush3.bf16.msra.mxu0 %v2298_v19  ;;  %2221 = vmatprep.mubr.msk.f32.mxu0 %vm2621_vm0, %v2622_v1 }
  0xc5   : > { %2300 = vmatprep.subr.bf16.mxu0 %v2620_v0 }
  0xcb   : > { %2222 = vmatmul.mubr.f32.vlgmr.msra.gmra.mrb[2].mxu0 %v2834_v10 }
  0xcc   : > { %2302 = vmatpush3.bf16.msra.mxu0 %v2286_v6  ;;  %2228 = vmatprep.mubr.msk.f32.mxu0 %vm2621_vm0, %v2622_v1 }
  0xd3   : > { %2229 = vmatmul.mubr.f32.vlgmr.msra.gmra.mrb[2].mxu0 %v2834_v10 }
 0x17a   : > { %v815_v40 = vpop.f32.mrb[0].mxu0 }
 0x17b   : > { %v2303_v42 = vadd.f32 %v815_v40, %v351_v38  ;;  %v2122_v43 = vpop.f32.mrb[1].mxu0 }
 0x17d   : > { %830 = vrot.lane.b32.xlu1 %v2303_v42, %s2623_s12  ;;  %822 = vrot.lane.b32.xlu0 %v2303_v42, %s2624_s21  ;;  %820 = vst.msk [vmem:[#allocation2] sm:$0x1] %vm819_vm3, %v2303_v42 }
 0x181   : > { %826 = vrot.lane.b32.xlu0 %v2303_v42, %s2625_s29 }
 0x1a6   : > { %v1834_v10 = vpop.f32.mrb[2].mxu0 }
 0x1a7   : > { %v2230_v28 = vpop.f32.mrb[3].mxu0  ;;  %v2305_v30 = vadd.f32 %v1834_v10, %v1375_v29 }
 0x1a9   : > { %1839 = vst.msk [vmem:[%s344_s10] sm:$0x1] %vm1838_vm5, %v2305_v30 }
 0x1ef   : > { %v831_v13 = vpop.permute.xlu1 %830  ;;  %v823_v20 = vpop.permute.xlu0 %822 }
 0x1f0   : > { %833 = vst.msk [vmem:[#allocation2 + $0x3] sm:$0x1] %vm819_vm3, %v831_v13  ;;  %825 = vst.msk [vmem:[#allocation2 + $0x1] sm:$0x1] %vm819_vm3, %v823_v20 }
 0x1f3   : > { %v827_v16 = vpop.permute.xlu0 %826 }
 0x1f4   : > { %829 = vst.msk [vmem:[#allocation2 + $0x2] sm:$0x1] %vm819_vm3, %v827_v16 }
 0x1fb   : > { %v834_v21 = vld [vmem:[#allocation2] sm:$0xf] }
 0x1fc   : > { %v848_v22 = vsel %vm846_vm4, %v834_v21, 0 }
 0x1fd   : > { %v919_v23 = vand.u32 4294901760, %v848_v22 }
 0x1ff   : > { %v920_v24 = vsub.f32 %v848_v22, %v919_v23 }
 0x201   : > { %v921_v25 = vand.u32 4294901760, %v920_v24 }
 0x203   : > { %v922_v26 = vsub.f32 %v920_v24, %v921_v25 }
 0x205   : > { %v923_v27 = vand.u32 4294901760, %v922_v26 }
 0x207   : > { %2132 = vmatmul.mubr.f32.vlgmr.msra.gmra.mrb[0].mxu1 %v923_v27 }
 0x208   : > { %2257 = vmatpush3.bf16.msra.mxu1 %v2906_v52  ;;  %2142 = vmatprep.mubr.msk.f32.mxu1 %vm2621_vm0, %v2622_v1 }
 0x209   : > { %2258 = vmatprep.subr.bf16.mxu1 %v2620_v0 }
 0x20c   : > { %2260 = vmatpush3.bf16.msra.mxu1 %v2259_v57 }
 0x20d   : > { %2261 = vmatprep.subr.bf16.mxu1 %v2620_v0 }
 0x20f   : > { %2143 = vmatmul.mubr.f32.vlgmr.msra.gmra.mrb[0].mxu1 %v919_v23 }
 0x210   : > { %2263 = vmatpush3.bf16.msra.mxu1 %v2262_v58  ;;  %2153 = vmatprep.mubr.msk.f32.mxu1 %vm2621_vm0, %v2622_v1 }
 0x211   : > { %2264 = vmatprep.subr.bf16.mxu1 %v2620_v0 }
 0x214   : > { %2266 = vmatpush3.bf16.msra.mxu1 %v2265_v59 }
 0x215   : > { %2267 = vmatprep.subr.bf16.mxu1 %v2620_v0 }
 0x217   : > { %2154 = vmatmul.mubr.f32.vlgmr.msra.gmra.mrb[0].mxu1 %v920_v24 }
 0x218   : > { %2269 = vmatpush3.bf16.msra.mxu1 %v2882_v34  ;;  %2164 = vmatprep.mubr.msk.f32.mxu1 %vm2621_vm0, %v2622_v1 }
 0x219   : > { %2270 = vmatprep.subr.bf16.mxu1 %v2620_v0 }
 0x21c   : > { %2272 = vmatpush3.bf16.msra.mxu1 %v2894_v41 }
 0x21d   : > { %2273 = vmatprep.subr.bf16.mxu1 %v2620_v0 }
 0x21f   : > { %2165 = vmatmul.mubr.f32.vlgmr.msra.gmra.mrb[0].mxu1 %v921_v25 }
 0x220   : > { %2275 = vmatpush3.bf16.msra.mxu1 %v2914_v60  ;;  %2175 = vmatprep.mubr.msk.f32.mxu1 %vm2621_vm0, %v2622_v1 }
 0x221   : > { %2276 = vmatprep.subr.bf16.mxu1 %v2620_v0 }
 0x224   : > { %2278 = vmatpush3.bf16.msra.mxu1 %v2916_v61 }
 0x225   : > { %2279 = vmatprep.subr.bf16.mxu1 %v2620_v0 }
 0x227   : > { %2176 = vmatmul.mubr.f32.vlgmr.msra.gmra.mrb[0].mxu1 %v919_v23 }
 0x228   : > { %2281 = vmatpush3.bf16.msra.mxu1 %v2882_v34  ;;  %2186 = vmatprep.mubr.msk.f32.mxu1 %vm2621_vm0, %v2622_v1 }
 0x229   : > { %2282 = vmatprep.subr.bf16.mxu1 %v2620_v0  ;;  %v2000_v0 = vld [vmem:[#allocation8] ss:$0 sm:$0xff] }
 0x22c   : > { %2284 = vmatpush3.bf16.msra.mxu1 %v2894_v41 }
 0x22f   : > { %2187 = vmatmul.mubr.f32.vlgmr.msra.gmra.mrb[0].mxu1 %v919_v23 }
 0x302   : > { %v1331_v1 = vpop.f32.mrb[0].mxu1 }
 0x303   : > { %v2304_v31 = vadd.f32 %v2000_v0, %v1331_v1  ;;  %v2188_v32 = vpop.f32.mrb[1].mxu1 }
 0x305   : > { %1343 = vrot.lane.b32.xlu0 %v2304_v31, %s2626_s25  ;;  %1338 = vrot.lane.b32.xlu1 %v2304_v31, %s2627_s26  ;;  %1336 = vst.msk [vmem:[%s2990_s19] sm:$0xf] %vm1335_vm6, %v2304_v31 }
 0x306   : > { %2524 = shalt.err (!%p2521_p11)
}
 0x307   : > { %s2525_s10 = scalar_lea.hbm %s2997_s14, 16  ;;  %s2529_s26 = scalar_lea.hbm %s3091_s8, 32 }
 0x308   : > { %p2526_p13 = scmp.ne.s32.totalorder %s2997_s14, %s2525_s10  ;;  %p2530_p6 = scmp.lt.u32.totalorder %s2997_s14, %s3091_s8 }
 0x309   : > { %p2531_p5 = scmp.lt.u32.totalorder %s2529_s26, %s2525_s10  ;;  %p2533_p9 = scmp.lt.u32.totalorder %s2525_s10, %s2997_s14 }
 0x30a   : > { %p2527_p1 = pnand %p2526_p13, %p3110_p10 }
 0x30b   : > { %p2532_p12 = por %p2531_p5, %p2530_p6 }
 0x30c   : > { %p2528_p0 = pneg %p2527_p1 }
 0x30d   : > { %p2534_p2 = por %p2533_p9, %p2532_p12 }
 0x30f   : > { %p2535_p3 = pnand %p2534_p2, %p2528_p0 }
 0x311   : > { %2538 = shalt.err (!%p2535_p3)
}
 0x312   : > { %2349 = dma.vmem_to_hbm [thread:$0]  (%p3110_p10), %s1875_s2, 16, %s2997_s14, %s1846_s17  }
 0x313   : > { %s2629_s22 = smov 92   ;;  %s2630_s24 = smov 101  }
 0x314   : > { %1353 = vrot.lane.b32.xlu0 %v2304_v31, %s2629_s22  ;;  %1348 = vrot.lane.b32.xlu1 %v2304_v31, %s2630_s24  ;;  %s2631_s18 = smov 74   ;;  %s2632_s20 = smov 83  }
 0x315   : > { %s2633_s10 = smov 65   ;;  %s1858_s14 = sshll.u32 %s2990_s19, 4  ;;  %s3031_s14 = int_to_ptr.vmem [resolvable:$true] %s1858_s14 }
 0x316   : > { %s2014_s2 = sshll.u32 %s2702_s9, 9  ;;  %s1841_s26 = scalar_lea.sflag [#allocation5], %s2985_s13 }
 0x317   : > { %s3036_s25 = scalar_lea.hbm %s3090_s7, %s2014_s2  ;;  %s2539_s12 = scalar_lea.vmem %s3031_s14, 512 }
 0x318   : > { %1363 = vrot.lane.b32.xlu0 %v2304_v31, %s2631_s18  ;;  %1358 = vrot.lane.b32.xlu1 %v2304_v31, %s2632_s20  ;;  %p2540_p4 = scmp.ne.s32.totalorder %s3031_s14, %s2539_s12  ;;  %s2634_s9 = smov [#allocation9]  }
 0x319   : > { %s2543_s21 = sshll.u32 %s2634_s9, 4  ;;  %s2544_s21 = int_to_ptr.vmem [resolvable:$false] %s2543_s21 }
 0x31a   : > { %p2541_p7 = pnand %p2540_p4, %p3110_p10  ;;  %s2545_s22 = scalar_lea.vmem %s2544_s21, 1024 }
 0x31b   : > { %p2546_p11 = scmp.lt.s32.totalorder %s3031_s14, %s2544_s21  ;;  %p2547_p13 = scmp.lt.s32.totalorder %s2545_s22, %s2539_s12 }
 0x31c   : > { %1368 = vrot.lane.b32.xlu1 %v2304_v31, %s2633_s10  ;;  %p2542_p8 = pneg %p2541_p7 }
 0x31d   : > { %p2548_p1 = por %p2547_p13, %p2546_p11 }
 0x31f   : > { %p2549_p0 = pnand %p2548_p1, %p2542_p8 }
 0x377   : > { %v1344_v33 = vpop.permute.xlu0 %1343  ;;  %v1339_v34 = vpop.permute.xlu1 %1338 }
 0x378   : > { %2002 = vst.msk [vmem:[%s2990_s19 + $0x8] sm:$0xf] %vm1335_vm6, %v1344_v33  ;;  %2001 = vst.msk [vmem:[%s2990_s19 + $0x4] sm:$0xf] %vm1335_vm6, %v1339_v34 }
 0x386   : > { %v1354_v35 = vpop.permute.xlu0 %1353  ;;  %v1349_v36 = vpop.permute.xlu1 %1348 }
 0x387   : > { %2004 = vst.msk [vmem:[%s2990_s19 + $0x10] sm:$0xf] %vm1335_vm6, %v1354_v35  ;;  %2003 = vst.msk [vmem:[%s2990_s19 + $0xc] sm:$0xf] %vm1335_vm6, %v1349_v36 }
 0x38a   : > { %v1364_v37 = vpop.permute.xlu0 %1363  ;;  %v1359_v38 = vpop.permute.xlu1 %1358 }
 0x38b   : > { %2006 = vst.msk [vmem:[%s2990_s19 + $0x18] sm:$0xf] %vm1335_vm6, %v1364_v37  ;;  %2005 = vst.msk [vmem:[%s2990_s19 + $0x14] sm:$0xf] %vm1335_vm6, %v1359_v38 }
 0x38e   : > { %v1369_v39 = vpop.permute.xlu1 %1368 }
 0x38f   : > { %2007 = vst.msk [vmem:[%s2990_s19 + $0x1c] sm:$0xf] %vm1335_vm6, %v1369_v39 }
 0x390   : > { %2552 = shalt.err (!%p2549_p0)
}
 0x391   : > { %s2553_s19 = scalar_lea.hbm %s3036_s25, 512  ;;  %s2557_s20 = scalar_lea.hbm %s3090_s7, 1024 }
 0x392   : > { %p2554_p6 = scmp.ne.s32.totalorder %s3036_s25, %s2553_s19  ;;  %p2558_p9 = scmp.lt.u32.totalorder %s3036_s25, %s3090_s7 }
 0x393   : > { %p2559_p2 = scmp.lt.u32.totalorder %s2557_s20, %s2553_s19  ;;  %p2561_p4 = scmp.lt.u32.totalorder %s2553_s19, %s3036_s25 }
 0x394   : > { %p2555_p5 = pnand %p2554_p6, %p3110_p10 }
 0x395   : > { %p2560_p3 = por %p2559_p2, %p2558_p9 }
 0x396   : > { %p2556_p12 = pneg %p2555_p5 }
 0x397   : > { %p2562_p7 = por %p2561_p4, %p2560_p3 }
 0x399   : > { %p2563_p8 = pnand %p2562_p7, %p2556_p12 }
 0x39b   : > { %2566 = shalt.err (!%p2563_p8)
}
 0x39c   : > { %s2635_s17 = smov 4  }
 0x39d   : > { %2348 = dma.vmem_to_hbm [thread:$0]  (%p3110_p10), %s3031_s14, 512, %s3036_s25, %s1841_s26, %s2625_s29, %s2625_s29, %s2635_s17  }
 0x39e PF: > { %p2375_p11 = scmp.ge.s32.totalorder %s2613_s30, 2  ;;  %s1886_s23 = sand.u32 1, %s2601_s27  }
 0x39f   : > { %p3111_p13 = scmp.ne.s32.totalorder %s3100_s16, 0  ;;  %s1887_s12 = scalar_lea.sflag [#allocation5], %s1886_s23 }
 0x3a1   : > { %p2363_p1 = pnand %p2375_p11, %p3111_p13 }
 0x3a3   : > { %2592 = dma.done.wait (!%p2363_p1), %s1887_s12, 512  }
 0x3a4   : > { %2594 = vsyncadd (!%p2363_p1), %s1887_s12, 4294966784  ;;  %s1896_s9 = scalar_lea.sflag [#allocation11], %s1886_s23 }
 0x3a5   : > { %2596 = dma.done.wait (!%p2363_p1), %s1896_s9, 16  }
 0x3a6   : > { %2598 = vsyncadd (!%p2363_p1), %s1896_s9, 4294967280  ;;  %s3112_s15 = sld [smem:[#allocation16_spill]]  ;;  %s3113_s29 = sld [smem:[#allocation17_spill]] }
 0x3a7   : > { %p24_p10 = scmp.ge.s32.totalorder %s2706_s11, 4   ;;  %s3114_s27 = smov %s2605_s28 }
 0x3a8   : > { %s3116_s30 = smov %s2706_s11 }
 0x3a9   :  { %26 = sbr.rel (!%p24_p10) target bundleno = 9 (0x9), region = 120 }
 0x3ac   : > { %s3115_s28 = smov %s3112_s15 }
 0x3b0   :  { %1900 = vsyncpa [#allocation4], 1 }
 0x3b1   :  { %1902 = vsyncpa [#allocation4 + $0x1], 1 }
 0x3b2   :  { %1903 = vsyncpa [#allocation7], 1 }
 0x3b3   :  { %1904 = vsyncpa [#allocation5], 1 }
 0x3b4   :  { %1906 = vsyncpa [#allocation5 + $0x1], 1 }
 0x3b5   :  { %1907 = vsyncpa [#allocation11], 1 }
 0x3b6   :  { %1909 = vsyncpa [#allocation11 + $0x1], 1 }

</bundles_post_ra>
